<compile_context>
chip_gen: v7x
topology: tpu7x:2x2x1
jax: 0.10.0
libtpu: 0.0.40
codegen_flags: <defaults>
</compile_context>

<pallas_src>
import functools

import jax
import jax.numpy as jnp
import numpy as np
from jax import lax
from jax.experimental import pallas as pl
from jax.experimental.pallas import tpu as pltpu

LANE = 128


def _round_up(x, m):
    return ((x + m - 1) // m) * m


def _choose_tile_hw(hw_p, cin, cout, itemsize, vmem_budget_bytes=4 * 1024 * 1024):
    """Largest multiple of 128 dividing hw_p whose double-buffered x+y tiles fit
    the budget (kept well under every generation's scoped-VMEM default)."""
    per_lane = 2 * (cin + cout) * itemsize  # x tile + y tile, double-buffered
    cap = max(LANE, (vmem_budget_bytes // per_lane) // LANE * LANE)
    t = max(LANE, (min(hw_p, cap) // LANE) * LANE)
    while hw_p % t != 0:  # hw_p is a multiple of 128, so this terminates at 128
        t -= LANE
    return t


def _outconv_kernel(x_ref, w_ref, b_ref, o_ref, *, use_mxu):
    # x_ref: (1, Cin, t_hw)  channels on sublanes, spatial on lanes
    # w_ref: (Cout, Cin)     resident (constant index_map -> fetched once)
    # b_ref: (Cout, 1)       resident
    # o_ref: (1, Cout, t_hw)
    x = x_ref[0]                                   # (Cin, t_hw)
    w = w_ref[...]                                 # (Cout, Cin)
    if use_mxu:
        # Sublane-aligned channel count: one MXU matmul, f32 accumulation.
        y = jnp.dot(w, x, preferred_element_type=jnp.float32)
    else:
        # Tiny / unaligned channel counts: Cin*Cout VPU fmas per lane are cheaper
        # than a heavily padded MXU matmul and lower unconditionally.
        xf = x.astype(jnp.float32)
        wf = w.astype(jnp.float32)
        cin = xf.shape[0]
        y = wf[:, 0:1] * xf[0:1, :]               # (Cout,1)*(1,t_hw) -> (Cout,t_hw)
        for ci in range(1, cin):
            y = y + wf[:, ci:ci + 1] * xf[ci:ci + 1, :]
    o_ref[0] = (y + b_ref[...].astype(jnp.float32)).astype(o_ref.dtype)


def outconv_forward(x_nchw, weight, bias):
    """PyTorch OutConv (1x1 Conv2d) forward.

    x_nchw: (N, Cin, H, W)
    weight: (Cout, Cin, 1, 1) or (Cout, Cin)   (PyTorch layout)
    bias:   (Cout,)
    Returns (N, Cout, H, W) in x's dtype.
    """
    N, Cin, H, W = x_nchw.shape
    Cout = weight.shape[0]
    w2 = weight.reshape(Cout, Cin)
    b2 = bias.reshape(Cout, 1)

    HW = H * W
    HW_p = _round_up(HW, LANE)
    itemsize = jnp.dtype(x_nchw.dtype).itemsize
    t_hw = _choose_tile_hw(HW_p, Cin, Cout, itemsize)
    use_mxu = (Cin % 8 == 0)

    # Merging (H, W) -> HW is a free contiguous reshape; NCHW layout is kept.
    x3 = x_nchw.reshape(N, Cin, HW)
    if HW_p != HW:
        # Rare fallback when H*W is not a multiple of 128 (one extra pass over x).
        x3 = jnp.pad(x3, ((0, 0), (0, 0), (0, HW_p - HW)))

    grid = (N, HW_p // t_hw)

    cost = pl.CostEstimate(
        flops=2 * N * HW * Cin * Cout,
        transcendentals=0,
        bytes_accessed=(x_nchw.size + w2.size + b2.size + N * Cout * HW) * itemsize,
    )

    out3 = pl.pallas_call(
        functools.partial(_outconv_kernel, use_mxu=use_mxu),
        out_shape=jax.ShapeDtypeStruct((N, Cout, HW_p), x_nchw.dtype),
        grid=grid,
        in_specs=[
            pl.BlockSpec((1, Cin, t_hw), lambda n, j: (n, 0, j)),   # activation tile
            pl.BlockSpec((Cout, Cin), lambda n, j: (0, 0)),         # weight (resident)
            pl.BlockSpec((Cout, 1), lambda n, j: (0, 0)),           # bias (resident)
        ],
        out_specs=pl.BlockSpec((1, Cout, t_hw), lambda n, j: (n, 0, j)),
        compiler_params=pltpu.CompilerParams(
            dimension_semantics=("parallel", "parallel"),
            vmem_limit_bytes=32 * 1024 * 1024,  # safe on v5e/v6e/v7x; tiles stay ~<=4 MiB
        ),
        cost_estimate=cost,
    )(x3, w2, b2)

    return out3[:, :, :HW].reshape(N, Cout, H, W)


# ---------------- pure-JAX reference (for correctness check) ----------------
def outconv_ref(x_nchw, weight, bias):
    Cout, Cin = weight.shape[0], weight.shape[1]
    w_hwio = weight.reshape(Cout, Cin).T.reshape(1, 1, Cin, Cout)
    y = lax.conv_general_dilated(
        x_nchw.astype(jnp.float32),
        w_hwio.astype(jnp.float32),
        (1, 1),
        [(0, 0), (0, 0)],
        dimension_numbers=("NCHW", "HWIO", "NCHW"),
    )
    return y + bias.reshape(1, -1, 1, 1)


if __name__ == "__main__":
    key = jax.random.PRNGKey(0)
    N, Cin, H, W, Cout = 2, 4, 16, 16, 8

    kx, kw, kb = jax.random.split(key, 3)
    x = jax.random.normal(kx, (N, Cin, H, W), jnp.float32)
    # PyTorch Conv2d(kernel_size=1) weight layout: (Cout, Cin, 1, 1).
    w = 0.1 * jax.random.normal(kw, (Cout, Cin, 1, 1), jnp.float32)
    b = 0.1 * jax.random.normal(kb, (Cout,), jnp.float32)

    out = jax.block_until_ready(outconv_forward(x, w, b))
    ref = jax.block_until_ready(outconv_ref(x, w, b))

    assert out.shape == (N, Cout, H, W), out.shape
    np.testing.assert_allclose(np.asarray(out), np.asarray(ref), rtol=1e-2, atol=1e-2)
    print("KERNEL_OK")
</pallas_src>

<mosaic_0001>
module attributes {stable_mosaic.version = 11 : i64} {
  func.func @_outconv_kernel(%arg0: i32, %arg1: i32, %arg2: memref<1x4x256xf32, #tpu.memory_space<vmem>>, %arg3: memref<8x4xf32, #tpu.memory_space<vmem>>, %arg4: memref<8x1xf32, #tpu.memory_space<vmem>>, %arg5: memref<1x8x256xf32, #tpu.memory_space<vmem>>) attributes {dimension_semantics = [#tpu.dimension_semantics<parallel>, #tpu.dimension_semantics<parallel>], iteration_bounds = array<i64: 2, 1>, scalar_prefetch = 0 : i64, scratch_operands = 0 : i64, tpu.core_type = #tpu.core_type<tc>, window_params = [{transform_indices = @transform_0, window_bounds = array<i64: 1, 4, 256>}, {pipeline_mode = #tpu.pipeline_mode<synchronous>, transform_indices = @transform_1, window_bounds = array<i64: 8, 4>}, {pipeline_mode = #tpu.pipeline_mode<synchronous>, transform_indices = @transform_2, window_bounds = array<i64: 8, 1>}, {transform_indices = @transform_3, window_bounds = array<i64: 1, 8, 256>}]} {
    %c0 = arith.constant 0 : index
    %c0_0 = arith.constant 0 : index
    %c0_1 = arith.constant 0 : index
    %0 = vector.load %arg2[%c0, %c0_0, %c0_1] : memref<1x4x256xf32, #tpu.memory_space<vmem>>, vector<1x4x256xf32>
    %1 = vector.shape_cast %0 : vector<1x4x256xf32> to vector<4x256xf32>
    %c0_2 = arith.constant 0 : index
    %c0_3 = arith.constant 0 : index
    %2 = vector.load %arg3[%c0_2, %c0_3] : memref<8x4xf32, #tpu.memory_space<vmem>>, vector<8x4xf32>
    %3 = vector.extract_strided_slice %2 {offsets = [0, 0], sizes = [8, 1], strides = [1, 1]} : vector<8x4xf32> to vector<8x1xf32>
    %4 = vector.extract_strided_slice %1 {offsets = [0, 0], sizes = [1, 256], strides = [1, 1]} : vector<4x256xf32> to vector<1x256xf32>
    %5 = vector.broadcast %3 : vector<8x1xf32> to vector<8x256xf32>
    %6 = vector.broadcast %4 : vector<1x256xf32> to vector<8x256xf32>
    %7 = arith.mulf %5, %6 : vector<8x256xf32>
    %8 = vector.extract_strided_slice %2 {offsets = [0, 1], sizes = [8, 1], strides = [1, 1]} : vector<8x4xf32> to vector<8x1xf32>
    %9 = vector.extract_strided_slice %1 {offsets = [1, 0], sizes = [1, 256], strides = [1, 1]} : vector<4x256xf32> to vector<1x256xf32>
    %10 = vector.broadcast %8 : vector<8x1xf32> to vector<8x256xf32>
    %11 = vector.broadcast %9 : vector<1x256xf32> to vector<8x256xf32>
    %12 = arith.mulf %10, %11 : vector<8x256xf32>
    %13 = arith.addf %7, %12 : vector<8x256xf32>
    %14 = vector.extract_strided_slice %2 {offsets = [0, 2], sizes = [8, 1], strides = [1, 1]} : vector<8x4xf32> to vector<8x1xf32>
    %15 = vector.extract_strided_slice %1 {offsets = [2, 0], sizes = [1, 256], strides = [1, 1]} : vector<4x256xf32> to vector<1x256xf32>
    %16 = vector.broadcast %14 : vector<8x1xf32> to vector<8x256xf32>
    %17 = vector.broadcast %15 : vector<1x256xf32> to vector<8x256xf32>
    %18 = arith.mulf %16, %17 : vector<8x256xf32>
    %19 = arith.addf %13, %18 : vector<8x256xf32>
    %20 = vector.extract_strided_slice %2 {offsets = [0, 3], sizes = [8, 1], strides = [1, 1]} : vector<8x4xf32> to vector<8x1xf32>
    %21 = vector.extract_strided_slice %1 {offsets = [3, 0], sizes = [1, 256], strides = [1, 1]} : vector<4x256xf32> to vector<1x256xf32>
    %22 = vector.broadcast %20 : vector<8x1xf32> to vector<8x256xf32>
    %23 = vector.broadcast %21 : vector<1x256xf32> to vector<8x256xf32>
    %24 = arith.mulf %22, %23 : vector<8x256xf32>
    %25 = arith.addf %19, %24 : vector<8x256xf32>
    %c0_4 = arith.constant 0 : index
    %c0_5 = arith.constant 0 : index
    %26 = vector.load %arg4[%c0_4, %c0_5] : memref<8x1xf32, #tpu.memory_space<vmem>>, vector<8x1xf32>
    %27 = vector.broadcast %26 : vector<8x1xf32> to vector<8x256xf32>
    %28 = arith.addf %25, %27 : vector<8x256xf32>
    %c0_6 = arith.constant 0 : index
    %c0_7 = arith.constant 0 : index
    %c0_8 = arith.constant 0 : index
    %29 = vector.load %arg5[%c0_6, %c0_7, %c0_8] : memref<1x8x256xf32, #tpu.memory_space<vmem>>, vector<1x8x256xf32>
    %30 = vector.shape_cast %29 : vector<1x8x256xf32> to vector<8x256xf32>
    %31 = vector.shape_cast %28 : vector<8x256xf32> to vector<1x8x256xf32>
    tpu.vector_store %arg5[%c0_6, %c0_7, %c0_8], %31 {strides = array<i32>} : memref<1x8x256xf32, #tpu.memory_space<vmem>>, vector<1x8x256xf32>,
    return
  }
  func.func @transform_0(%arg0: i32, %arg1: i32) -> (i32, i32, i32) {
    %c0_i32 = arith.constant 0 : i32
    %c0_i32_0 = arith.constant 0 : i32
    return %arg0, %c0_i32, %arg1 : i32, i32, i32
  }
  func.func @transform_1(%arg0: i32, %arg1: i32) -> (i32, i32) {
    %c0_i32 = arith.constant 0 : i32
    %c0_i32_0 = arith.constant 0 : i32
    %c0_i32_1 = arith.constant 0 : i32
    return %c0_i32, %c0_i32_0 : i32, i32
  }
  func.func @transform_2(%arg0: i32, %arg1: i32) -> (i32, i32) {
    %c0_i32 = arith.constant 0 : i32
    %c0_i32_0 = arith.constant 0 : i32
    %c0_i32_1 = arith.constant 0 : i32
    return %c0_i32, %c0_i32_0 : i32, i32
  }
  func.func @transform_3(%arg0: i32, %arg1: i32) -> (i32, i32, i32) {
    %c0_i32 = arith.constant 0 : i32
    %c0_i32_0 = arith.constant 0 : i32
    return %arg0, %c0_i32, %arg1 : i32, i32, i32
  }
}

</mosaic_0001>

<bundles_post_ra>
// kernel: tpu_custom_call.1
= control target key start
LH: loop header
LB: loop body
LE: loop exit
PB: predicated region body
PF: predicated region fallthrough
CT: control target
= control target key end

     0   :  { %8 = vsyncpa [#allocation3], 0  ;;  %s716_s0 = inlined_call_operand.vmem [shape: f32[2,4,256], index: 0, kind: input, shape index: {}]   ;;  %s717_s1 = inlined_call_operand.vmem [shape: f32[8,4], index: 1, kind: input, shape index: {}]   ;;  %s718_s2 = inlined_call_operand.vmem [shape: f32[8,1], index: 2, kind: input, shape index: {}]   ;;  %s719_s3 = inlined_call_operand.hbm [shape: f32[2,8,256], index: 3, kind: output, shape index: {}]  }
   0x1   :  { %10 = vsyncpa [#allocation3 + $0x1], 0  ;;  %s594_s12 = smov 0   ;;  %s596_s13 = smov 0  }
   0x2   :  { %s598_s14 = smov 0   ;;  %s600_s15 = smov 0  }
   0x3   :  { %s602_s16 = smov 0   ;;  %s604_s17 = smov 0  }
   0x4 LB: > { %s409_s18 = sadd.s32 4294967295, %s567_s17   ;;  %s410_s19 = sadd.s32 4294967294, %s567_s17   ;;  %s567_s17 = sphi %s604_s17, %s16_s17   ;;  %s563_s16 = sphi %s602_s16, %s726_s16   ;;  %s559_s15 = sphi %s600_s15, %s725_s15   ;;  %s555_s14 = sphi %s598_s14, %s724_s14   ;;  %s551_s13 = sphi %s596_s13, %s723_s13   ;;  %s547_s12 = sphi %s594_s12, %s722_s12  }
   0x5   : > { %s28_s20 = sadd.s32 1, %s563_s16  ;;  %s107_s21 = sadd.s32 1, %s555_s14 }
   0x6   : > { %p30_p0 = scmp.ge.s32.totalorder %s28_s20, 2  ;;  %p117_p1 = scmp.ne.s32.totalorder %s555_s14, %s551_s13 }
   0x7   : > { %p118_p2 = scmp.eq.s32.totalorder %s409_s18, 1  ;;  %p123_p3 = scmp.ne.s32.totalorder %s551_s13, %s547_s12 }
   0x8   : > { %s728_s20 = smov (%p30_p0, %s28_s20), 0  ;;  %p124_p5 = scmp.eq.s32.totalorder %s410_s19, 1 }
   0x9   : > { %p634_p4 = por %p118_p2, %p117_p1  ;;  %s102_s23 = ssub.s32 %s563_s16, %s728_s20 }
   0xa   : > { %p413_p6 = scmp.ge.s32.totalorder %s567_s17, 1  ;;  %p105_p7 = scmp.eq.s32.totalorder %s102_s23, 0 }
   0xb   : > { %p641_p8 = por %p124_p5, %p123_p3  ;;  %p161_p9 = scmp.lt.s32.totalorder %s567_s17, 3 }
   0xc   : > { %s647_s25 = scalar_select %p105_p7, %s555_s14, %s107_s21  }
   0xd   : > { %p162_p10 = pnand %p413_p6, %p161_p9 }
   0xe   : > { %v201_v0 = vld [vmem:[%s717_s1] sm:$0xff] (!%p162_p10)  ;;  %v569_v1 = vmov (!%p162_p10), 0   ;;  %v570_v2 = vmov (!%p162_p10), 2   ;;  %v571_v3 = vmov (!%p162_p10), 1   ;;  %v572_v4 = vmov (!%p162_p10), 3   ;;  %p190_p11 = scmp.lt.s32.totalorder (!%p162_p10), %s559_s15, 1 }
   0xf   : > { %165 = sbr.rel (%p162_p10) target bundleno = 173 (0xad), region = 32  ;;  %483 = vset.pattern.permute.xlu0 (!%p162_p10), %v569_v1  ;;  %485 = vset.pattern.permute.xlu1 (!%p162_p10), %v570_v2  ;;  %v306_v5 = vld [vmem:[%s718_s2] sm:$0xff] (!%p162_p10)  ;;  %v208_v6 = vlaneseq (!%p162_p10)  ;;  %s186_s8 = sand.u32 (!%p162_p10), 1, %s551_s13  }
  0x10   : > { %204 = vperm.xlu0 (!%p162_p10), %483, %v201_v0   ;;  %255 = vperm.xlu1 (!%p162_p10), %485, %v201_v0   ;;  %s414_s9 = sshll.u32 (!%p162_p10), %s186_s8, 4  ;;  %s423_s10 = sshll.u32 (!%p162_p10), %s559_s15, 8 }
  0x11   : > { %v209_v7 = vshrl.u32 (!%p162_p10), %v208_v6, 7  ;;  %s188_s11 = scalar_lea.vmem (!%p162_p10), [#allocation2], %s414_s9  ;;  %s667_s23 = scalar_lea.hbm (!%p162_p10), %s719_s3, %s423_s10 }
  0x12   : > { %s333_s18 = sshll.u32 (!%p162_p10), %s188_s11, 4  ;;  %s573_s27 = smov (!%p162_p10), [#allocation2]   ;;  %s669_s18 = int_to_ptr.vmem [resolvable:$true] %s333_s18 }
  0x13   : > { %v210_v8 = vsub.s32 (!%p162_p10), 0, %v209_v7  ;;  %v214_v9 = vsub.s32 (!%p162_p10), 4, %v209_v7  ;;  %v234_v10 = vsub.s32 (!%p162_p10), 1, %v209_v7  ;;  %v238_v11 = vsub.s32 (!%p162_p10), 5, %v209_v7  ;;  %s489_s26 = scalar_lea.vmem (!%p162_p10), %s669_s18, 256  ;;  %s493_s28 = sshll.u32 (!%p162_p10), %s573_s27, 4  ;;  %s494_s28 = int_to_ptr.vmem [resolvable:$false] %s493_s28 }
  0x14   : > { %484 = vset.pattern.permute.xlu0 (!%p162_p10), %v571_v3  ;;  %486 = vset.pattern.permute.xlu1 (!%p162_p10), %v572_v4  ;;  %v260_v13 = vsub.s32 (!%p162_p10), 2, %v209_v7  ;;  %v264_v14 = vsub.s32 (!%p162_p10), 6, %v209_v7  ;;  %v286_v15 = vsub.s32 (!%p162_p10), 3, %v209_v7  ;;  %v290_v16 = vsub.s32 (!%p162_p10), 7, %v209_v7  ;;  %p490_p12 = scmp.ne.s32.totalorder (!%p162_p10), %s669_s18, %s489_s26  ;;  %s495_s29 = scalar_lea.vmem (!%p162_p10), %s494_s28, 512 }
  0x15   : > { %229 = vperm.xlu0 (!%p162_p10), %484, %v201_v0   ;;  %281 = vperm.xlu1 (!%p162_p10), %486, %v201_v0   ;;  %p496_p1 = scmp.lt.s32.totalorder (!%p162_p10), %s669_s18, %s494_s28  ;;  %p497_p2 = scmp.lt.s32.totalorder (!%p162_p10), %s495_s29, %s489_s26 }
  0x16   : > { %s191_s30 = scalar_select %p190_p11, %s559_s15, 1 }
  0x17   : > { %s317_s15 = scalar_lea.sflag [#allocation3], %s186_s8  ;;  %p491_p13 = pnand %p490_p12, %p634_p4 }
  0x18   : > { %s422_s4 = sshll.u32 %s191_s30, 3  ;;  %p498_p3 = por %p497_p2, %p496_p1 }
  0x19   : > { %487 = vset.pattern.permute.xlu1 %v569_v1  ;;  %488 = vset.pattern.permute.xlu0 %v569_v1  ;;  %s197_s7 = scalar_lea.vmem %s716_s0, %s422_s4  ;;  %p492_p0 = pneg %p491_p13 }
  0x1a   : > { %309 = vperm.xlu1 %487, %v306_v5   ;;  %v200_v12 = vld [vmem:[%s197_s7] sm:$0xff] }
  0x1b   : > { %v211_v17 = vrot.slane %v200_v12, %v210_v8  ;;  %v215_v18 = vrot.slane %v200_v12, %v214_v9  ;;  %v235_v19 = vrot.slane %v200_v12, %v234_v10  ;;  %v239_v20 = vrot.slane %v200_v12, %v238_v11  ;;  %p499_p5 = pnand %p498_p3, %p492_p0 }
  0x1c   : > { %v261_v21 = vrot.slane %v200_v12, %v260_v13  ;;  %v265_v22 = vrot.slane %v200_v12, %v264_v14  ;;  %v287_v25 = vrot.slane %v200_v12, %v286_v15  ;;  %v291_v26 = vrot.slane %v200_v12, %v290_v16 }
  0x1d   : > { %v221_v27 = vrot.slane %v211_v17, %v210_v8  ;;  %v225_v28 = vrot.slane %v215_v18, %v210_v8  ;;  %v245_v29 = vrot.slane %v235_v19, %v234_v10  ;;  %v249_v30 = vrot.slane %v239_v20, %v234_v10 }
  0x1e   : > { %v271_v31 = vrot.slane %v261_v21, %v260_v13  ;;  %v275_v32 = vrot.slane %v265_v22, %v260_v13  ;;  %v297_v33 = vrot.slane %v287_v25, %v286_v15  ;;  %v301_v34 = vrot.slane %v291_v26, %v286_v15 }
  0x8f   : > { %v205_v23 = vpop.permute.xlu0 %204  ;;  %v256_v24 = vpop.permute.xlu1 %255 }
  0x90   : > { %v226_v37 = vmul.f32 %v221_v27, %v205_v23  ;;  %v227_v38 = vmul.f32 %v225_v28, %v205_v23  ;;  %v276_v41 = vmul.f32 %v271_v31, %v256_v24  ;;  %v277_v42 = vmul.f32 %v275_v32, %v256_v24 }
  0x94   : > { %v230_v35 = vpop.permute.xlu0 %229  ;;  %v282_v36 = vpop.permute.xlu1 %281 }
  0x95   : > { %v250_v39 = vmul.f32 %v245_v29, %v230_v35  ;;  %v251_v40 = vmul.f32 %v249_v30, %v230_v35  ;;  %v302_v45 = vmul.f32 %v297_v33, %v282_v36  ;;  %v303_v46 = vmul.f32 %v301_v34, %v282_v36 }
  0x97   : > { %v252_v43 = vadd.f32 %v250_v39, %v226_v37  ;;  %v253_v44 = vadd.f32 %v251_v40, %v227_v38 }
  0x99   : > { %v278_v47 = vadd.f32 %v276_v41, %v252_v43  ;;  %v279_v48 = vadd.f32 %v277_v42, %v253_v44  ;;  %v310_v49 = vpop.permute.xlu1 %309 }
  0x9b   : > { %v304_v50 = vadd.f32 %v302_v45, %v278_v47  ;;  %v305_v51 = vadd.f32 %v303_v46, %v279_v48 }
  0x9d   : > { %v312_v52 = vadd.f32 %v310_v49, %v304_v50  ;;  %v313_v53 = vadd.f32 %v310_v49, %v305_v51 }
  0x9f   : > { %314 = vst [vmem:[%s188_s11] sm:$0xff] %v312_v52  ;;  %315 = vst [vmem:[%s188_s11 + $0x8] sm:$0xff] %v313_v53 }
  0xa0   : > { %502 = shalt.err (!%p499_p5)
}
  0xa1   : > { %s503_s30 = scalar_lea.hbm %s667_s23, 256  ;;  %s507_s6 = scalar_lea.hbm %s719_s3, 512 }
  0xa2   : > { %p504_p6 = scmp.ne.s32.totalorder %s667_s23, %s503_s30  ;;  %p508_p10 = scmp.lt.u32.totalorder %s667_s23, %s719_s3 }
  0xa3   : > { %p509_p11 = scmp.lt.u32.totalorder %s507_s6, %s503_s30  ;;  %p511_p13 = scmp.lt.u32.totalorder %s503_s30, %s667_s23 }
  0xa4   : > { %p505_p7 = pnand %p504_p6, %p634_p4 }
  0xa5   : > { %p510_p12 = por %p509_p11, %p508_p10 }
  0xa6   : > { %p506_p9 = pneg %p505_p7 }
  0xa7   : > { %p512_p0 = por %p511_p13, %p510_p12 }
  0xa9   : > { %p513_p1 = pnand %p512_p0, %p506_p9 }
  0xab   : > { %516 = shalt.err (!%p513_p1)
}
  0xac   : > { %424 = dma.vmem_to_hbm [thread:$0]  (%p634_p4), %s669_s18, 256, %s667_s23, %s317_s15  }
  0xad PF: > { %p430_p2 = scmp.ge.s32.totalorder %s567_s17, 2  ;;  %s345_s9 = sand.u32 1, %s547_s12  }
  0xae   : > { %s346_s10 = scalar_lea.sflag [#allocation3], %s345_s9 }
  0xaf   : > { %p427_p3 = pnand %p430_p2, %p641_p8 }
  0xb1   : > { %542 = dma.done.wait (!%p427_p3), %s346_s10, 256  }
  0xb2   : > { %544 = vsyncadd (!%p427_p3), %s346_s10, 4294967040  ;;  %s16_s17 = sadd.s32 1, %s567_s17   ;;  %s722_s12 = smov %s551_s13 }
  0xb3   : > { %p13_p5 = scmp.ge.s32.totalorder %s16_s17, 4   ;;  %s723_s13 = smov %s555_s14 }
  0xb4   : > { %s724_s14 = smov %s647_s25  ;;  %s725_s15 = smov %s563_s16 }
  0xb5   : > { %s726_s16 = smov %s728_s20  ;;  %15 = sbr.rel (!%p13_p5) target bundleno = 4 (0x4), region = 67 }
  0xbc   :  { %351 = vsyncpa [#allocation3], 1 }
  0xbd   :  { %353 = vsyncpa [#allocation3 + $0x1], 1 }

</bundles_post_ra>
